<compile_context>
chip_gen: v6e
topology: v6e:2x2x1
jax: 0.10.0
libtpu: 0.0.40
codegen_flags: <defaults>
</compile_context>

<pallas_src>
import functools

import jax
import jax.numpy as jnp
from jax import lax
from jax.experimental import pallas as pl
from jax.experimental.pallas import tpu as pltpu

_LANES = 128
_SUBLANES = 8


def _color_loss_kernel(res_ref, gt_ref, out_ref, *, hw, row_tile, bn, need_mask):
    # Block shapes: res/gt (bn, 3, row_tile, 128); out (1, 1, 8, 128).
    res = res_ref[...]
    gt = gt_ref[...]

    res_r = res[:, 0].astype(jnp.float32)
    res_g = res[:, 1].astype(jnp.float32)
    res_b = res[:, 2].astype(jnp.float32)
    gt_r = gt[:, 0].astype(jnp.float32)
    gt_g = gt[:, 1].astype(jnp.float32)
    gt_b = gt[:, 2].astype(jnp.float32)

    # Folded constants:
    #   r     = (res_s_r - gt_s_r)            = 127.5 * (res_r - gt_r)
    #   rmean = (res_s_r + gt_s_r) / 2        = 63.75 * (res_r + gt_r) + 127.5
    #   (512 + rmean)/256 = 2 + rmean/256 ;  (767 - rmean)/256 = 2.99609375 - rmean/256
    r = 127.5 * (res_r - gt_r)
    g = 127.5 * (res_g - gt_g)
    b = 127.5 * (res_b - gt_b)
    m = (63.75 * (res_r + gt_r) + 127.5) * (1.0 / 256.0)

    p = (2.0 + m) * (r * r) + 4.0 * (g * g) + (2.99609375 - m) * (b * b)
    term = jnp.sqrt(p + 1e-8)  # (bn, row_tile, 128)

    if need_mask:
        j = pl.program_id(1)
        row_ids = lax.broadcasted_iota(jnp.int32, (row_tile, _LANES), 0)
        lane_ids = lax.broadcasted_iota(jnp.int32, (row_tile, _LANES), 1)
        pix = (j * row_tile + row_ids) * _LANES + lane_ids
        term = jnp.where((pix < hw)[None], term, 0.0)

    # Fold into a vreg-shaped (8, 128) partial: only elementwise vreg adds,
    # no cross-lane/sublane reduce on the per-step path.
    partial = jnp.sum(
        term.reshape(bn * row_tile // _SUBLANES, _SUBLANES, _LANES), axis=0)
    out_ref[...] = partial[None, None]


def color_loss(res, gt):
    assert res.shape == gt.shape
    n, c, h, w = res.shape
    assert c == 3, "ColorLoss expects 3-channel (RGB) inputs in NCHW"
    hw = h * w

    # Keep native float dtype (e.g. bf16) to halve HBM traffic; only promote
    # non-float inputs.
    if not jnp.issubdtype(res.dtype, jnp.floating):
        res = res.astype(jnp.float32)
    if not jnp.issubdtype(gt.dtype, jnp.floating):
        gt = gt.astype(jnp.float32)
    itemsize = jnp.dtype(res.dtype).itemsize

    # Lane-dense layout: rows of 128 lanes per image plane.
    s = pl.cdiv(hw, _LANES)
    s = ((s + _SUBLANES - 1) // _SUBLANES) * _SUBLANES  # sublane-aligned rows

    # ~2 MiB per input block keeps double-buffered streaming comfortably within
    # VMEM on v5e/v6e/v7x.
    target_block_bytes = 2 * 1024 * 1024
    max_rows = max(_SUBLANES, target_block_bytes // (3 * _LANES * itemsize))
    row_tile = min(s, (max_rows // _SUBLANES) * _SUBLANES)
    row_tile = max(row_tile, _SUBLANES)
    s_total = ((s + row_tile - 1) // row_tile) * row_tile
    n_row_tiles = s_total // row_tile

    # Fuse batch elements when a whole image fits in one (small) tile.
    bn = 1
    if n_row_tiles == 1:
        block_bytes = 3 * row_tile * _LANES * itemsize
        for cand in range(n, 0, -1):
            if n % cand == 0 and cand * block_bytes <= target_block_bytes:
                bn = cand
                break
    n_batch_tiles = n // bn

    pad = s_total * _LANES - hw
    res_p = res.reshape(n, 3, hw)
    gt_p = gt.reshape(n, 3, hw)
    if pad:
        res_p = jnp.pad(res_p, ((0, 0), (0, 0), (0, pad)))
        gt_p = jnp.pad(gt_p, ((0, 0), (0, 0), (0, pad)))
    res_p = res_p.reshape(n, 3, s_total, _LANES)
    gt_p = gt_p.reshape(n, 3, s_total, _LANES)

    kernel = functools.partial(
        _color_loss_kernel, hw=hw, row_tile=row_tile, bn=bn, need_mask=pad > 0)

    partials = pl.pallas_call(
        kernel,
        out_shape=jax.ShapeDtypeStruct(
            (n_batch_tiles, n_row_tiles, _SUBLANES, _LANES), jnp.float32),
        grid_spec=pltpu.PrefetchScalarGridSpec(
            num_scalar_prefetch=0,
            grid=(n_batch_tiles, n_row_tiles),
            in_specs=[
                pl.BlockSpec((bn, 3, row_tile, _LANES),
                             lambda i, j: (i, 0, j, 0)),
                pl.BlockSpec((bn, 3, row_tile, _LANES),
                             lambda i, j: (i, 0, j, 0)),
            ],
            out_specs=pl.BlockSpec((1, 1, _SUBLANES, _LANES),
                                   lambda i, j: (i, j, 0, 0)),
        ),
        compiler_params=pltpu.CompilerParams(
            dimension_semantics=("parallel", "parallel"),
            vmem_limit_bytes=32 * 1024 * 1024),
    )(res_p, gt_p)

    # Final reduction + normalization with a precomputed reciprocal.
    return jnp.sum(partials) * (1.0 / (n * hw * 255.0))


def _reference_color_loss(res, gt):
    res = (res + 1.0) * 127.5
    gt = (gt + 1.0) * 127.5
    r_mean = (res[:, 0] + gt[:, 0]) / 2.0
    r = res[:, 0] - gt[:, 0]
    g = res[:, 1] - gt[:, 1]
    b = res[:, 2] - gt[:, 2]
    p = (512 + r_mean) * r * r / 256 + 4 * g * g + (767 - r_mean) * b * b / 256
    return jnp.mean(jnp.sqrt(p + 1e-8)) / 255.0


if __name__ == "__main__":
    key = jax.random.PRNGKey(0)
    k1, k2 = jax.random.split(key)
    # Small shapes: batch=2, channels=3 (RGB), spatial=16x16, values in [-1, 1]
    res = jax.random.uniform(k1, (2, 3, 16, 16), jnp.float32, -1.0, 1.0)
    gt = jax.random.uniform(k2, (2, 3, 16, 16), jnp.float32, -1.0, 1.0)

    loss = jax.block_until_ready(color_loss(res, gt))
    ref = _reference_color_loss(res, gt)

    assert jnp.allclose(loss, ref, rtol=1e-5, atol=1e-6), (loss, ref)
    print("KERNEL_OK")
</pallas_src>

<mosaic_0001>
module attributes {stable_mosaic.version = 11 : i64} {
  func.func @_color_loss_kernel(%arg0: i32, %arg1: i32, %arg2: memref<2x3x8x128xf32, #tpu.memory_space<vmem>>, %arg3: memref<2x3x8x128xf32, #tpu.memory_space<vmem>>, %arg4: memref<1x1x8x128xf32, #tpu.memory_space<vmem>>) attributes {dimension_semantics = [#tpu.dimension_semantics<parallel>, #tpu.dimension_semantics<parallel>], iteration_bounds = array<i64: 1, 1>, scalar_prefetch = 0 : i64, scratch_operands = 0 : i64, tpu.core_type = #tpu.core_type<tc>, window_params = [{transform_indices = @transform_0, window_bounds = array<i64: 2, 3, 8, 128>}, {transform_indices = @transform_1, window_bounds = array<i64: 2, 3, 8, 128>}, {transform_indices = @transform_2, window_bounds = array<i64: 1, 1, 8, 128>}]} {
    %c0 = arith.constant 0 : index
    %c0_0 = arith.constant 0 : index
    %c0_1 = arith.constant 0 : index
    %c0_2 = arith.constant 0 : index
    %0 = vector.load %arg2[%c0, %c0_0, %c0_1, %c0_2] : memref<2x3x8x128xf32, #tpu.memory_space<vmem>>, vector<2x3x8x128xf32>
    %c0_3 = arith.constant 0 : index
    %c0_4 = arith.constant 0 : index
    %c0_5 = arith.constant 0 : index
    %c0_6 = arith.constant 0 : index
    %1 = vector.load %arg3[%c0_3, %c0_4, %c0_5, %c0_6] : memref<2x3x8x128xf32, #tpu.memory_space<vmem>>, vector<2x3x8x128xf32>
    %2 = vector.extract_strided_slice %0 {offsets = [0, 0, 0, 0], sizes = [2, 1, 8, 128], strides = [1, 1, 1, 1]} : vector<2x3x8x128xf32> to vector<2x1x8x128xf32>
    %3 = vector.shape_cast %2 : vector<2x1x8x128xf32> to vector<2x8x128xf32>
    %4 = vector.extract_strided_slice %0 {offsets = [0, 1, 0, 0], sizes = [2, 1, 8, 128], strides = [1, 1, 1, 1]} : vector<2x3x8x128xf32> to vector<2x1x8x128xf32>
    %5 = vector.shape_cast %4 : vector<2x1x8x128xf32> to vector<2x8x128xf32>
    %6 = vector.extract_strided_slice %0 {offsets = [0, 2, 0, 0], sizes = [2, 1, 8, 128], strides = [1, 1, 1, 1]} : vector<2x3x8x128xf32> to vector<2x1x8x128xf32>
    %7 = vector.shape_cast %6 : vector<2x1x8x128xf32> to vector<2x8x128xf32>
    %8 = vector.extract_strided_slice %1 {offsets = [0, 0, 0, 0], sizes = [2, 1, 8, 128], strides = [1, 1, 1, 1]} : vector<2x3x8x128xf32> to vector<2x1x8x128xf32>
    %9 = vector.shape_cast %8 : vector<2x1x8x128xf32> to vector<2x8x128xf32>
    %10 = vector.extract_strided_slice %1 {offsets = [0, 1, 0, 0], sizes = [2, 1, 8, 128], strides = [1, 1, 1, 1]} : vector<2x3x8x128xf32> to vector<2x1x8x128xf32>
    %11 = vector.shape_cast %10 : vector<2x1x8x128xf32> to vector<2x8x128xf32>
    %12 = vector.extract_strided_slice %1 {offsets = [0, 2, 0, 0], sizes = [2, 1, 8, 128], strides = [1, 1, 1, 1]} : vector<2x3x8x128xf32> to vector<2x1x8x128xf32>
    %13 = vector.shape_cast %12 : vector<2x1x8x128xf32> to vector<2x8x128xf32>
    %14 = arith.subf %3, %9 : vector<2x8x128xf32>
    %cst = arith.constant 1.275000e+02 : f32
    %15 = vector.broadcast %cst : f32 to vector<2x8x128xf32>
    %16 = arith.mulf %15, %14 : vector<2x8x128xf32>
    %17 = arith.subf %5, %11 : vector<2x8x128xf32>
    %cst_7 = arith.constant 1.275000e+02 : f32
    %18 = vector.broadcast %cst_7 : f32 to vector<2x8x128xf32>
    %19 = arith.mulf %18, %17 : vector<2x8x128xf32>
    %20 = arith.subf %7, %13 : vector<2x8x128xf32>
    %cst_8 = arith.constant 1.275000e+02 : f32
    %21 = vector.broadcast %cst_8 : f32 to vector<2x8x128xf32>
    %22 = arith.mulf %21, %20 : vector<2x8x128xf32>
    %23 = arith.addf %3, %9 : vector<2x8x128xf32>
    %cst_9 = arith.constant 6.375000e+01 : f32
    %24 = vector.broadcast %cst_9 : f32 to vector<2x8x128xf32>
    %25 = arith.mulf %24, %23 : vector<2x8x128xf32>
    %cst_10 = arith.constant 1.275000e+02 : f32
    %26 = vector.broadcast %cst_10 : f32 to vector<2x8x128xf32>
    %27 = arith.addf %25, %26 : vector<2x8x128xf32>
    %cst_11 = arith.constant 3.906250e-03 : f32
    %28 = vector.broadcast %cst_11 : f32 to vector<2x8x128xf32>
    %29 = arith.mulf %27, %28 : vector<2x8x128xf32>
    %cst_12 = arith.constant 2.000000e+00 : f32
    %30 = vector.broadcast %cst_12 : f32 to vector<2x8x128xf32>
    %31 = arith.addf %30, %29 : vector<2x8x128xf32>
    %32 = arith.mulf %16, %16 : vector<2x8x128xf32>
    %33 = arith.mulf %31, %32 : vector<2x8x128xf32>
    %34 = arith.mulf %19, %19 : vector<2x8x128xf32>
    %cst_13 = arith.constant 4.000000e+00 : f32
    %35 = vector.broadcast %cst_13 : f32 to vector<2x8x128xf32>
    %36 = arith.mulf %35, %34 : vector<2x8x128xf32>
    %37 = arith.addf %33, %36 : vector<2x8x128xf32>
    %cst_14 = arith.constant 2.99609375 : f32
    %38 = vector.broadcast %cst_14 : f32 to vector<2x8x128xf32>
    %39 = arith.subf %38, %29 : vector<2x8x128xf32>
    %40 = arith.mulf %22, %22 : vector<2x8x128xf32>
    %41 = arith.mulf %39, %40 : vector<2x8x128xf32>
    %42 = arith.addf %37, %41 : vector<2x8x128xf32>
    %cst_15 = arith.constant 9.99999993E-9 : f32
    %43 = vector.broadcast %cst_15 : f32 to vector<2x8x128xf32>
    %44 = arith.addf %42, %43 : vector<2x8x128xf32>
    %45 = math.sqrt %44 : vector<2x8x128xf32>
    %46 = tpu.iota {dimensions = array<i32: 0>} : vector<8x128xi32>
    %47 = tpu.iota {dimensions = array<i32: 1>} : vector<8x128xi32>
    %c8_i32 = arith.constant 8 : i32
    %48 = arith.muli %arg1, %c8_i32 : i32
    %49 = vector.broadcast %48 : i32 to vector<8x128xi32>
    %50 = arith.addi %49, %46 : vector<8x128xi32>
    %c128_i32 = arith.constant 128 : i32
    %51 = vector.broadcast %c128_i32 : i32 to vector<8x128xi32>
    %52 = arith.muli %50, %51 : vector<8x128xi32>
    %53 = arith.addi %52, %47 : vector<8x128xi32>
    %c256_i32 = arith.constant 256 : i32
    %54 = vector.broadcast %c256_i32 : i32 to vector<8x128xi32>
    %55 = arith.cmpi slt, %53, %54 : vector<8x128xi32>
    %56 = vector.shape_cast %55 : vector<8x128xi1> to vector<1x8x128xi1>
    %cst_16 = arith.constant 0.000000e+00 : f32
    %57 = vector.shape_cast %56 : vector<1x8x128xi1> to vector<1x8x128xi1>
    %58 = vector.broadcast %57 : vector<1x8x128xi1> to vector<2x8x128xi1>
    %59 = vector.broadcast %cst_16 : f32 to vector<2x8x128xf32>
    %60 = arith.select %58, %45, %59 : vector<2x8x128xi1>, vector<2x8x128xf32>
    %cst_17 = arith.constant dense<0.000000e+00> : vector<8x128xf32>
    %61 = vector.multi_reduction <add>, %60, %cst_17 [0] : vector<2x8x128xf32> to vector<8x128xf32>
    %62 = vector.shape_cast %61 : vector<8x128xf32> to vector<1x1x8x128xf32>
    %c0_18 = arith.constant 0 : index
    %c0_19 = arith.constant 0 : index
    %c0_20 = arith.constant 0 : index
    %c0_21 = arith.constant 0 : index
    %63 = vector.load %arg4[%c0_18, %c0_19, %c0_20, %c0_21] : memref<1x1x8x128xf32, #tpu.memory_space<vmem>>, vector<1x1x8x128xf32>
    tpu.vector_store %arg4[%c0_18, %c0_19, %c0_20, %c0_21], %62 {strides = array<i32>} : memref<1x1x8x128xf32, #tpu.memory_space<vmem>>, vector<1x1x8x128xf32>,
    return
  }
  func.func @transform_0(%arg0: i32, %arg1: i32) -> (i32, i32, i32, i32) {
    %c0_i32 = arith.constant 0 : i32
    %c0_i32_0 = arith.constant 0 : i32
    %c0_i32_1 = arith.constant 0 : i32
    return %arg0, %c0_i32, %arg1, %c0_i32_0 : i32, i32, i32, i32
  }
  func.func @transform_1(%arg0: i32, %arg1: i32) -> (i32, i32, i32, i32) {
    %c0_i32 = arith.constant 0 : i32
    %c0_i32_0 = arith.constant 0 : i32
    %c0_i32_1 = arith.constant 0 : i32
    return %arg0, %c0_i32, %arg1, %c0_i32_0 : i32, i32, i32, i32
  }
  func.func @transform_2(%arg0: i32, %arg1: i32) -> (i32, i32, i32, i32) {
    %c0_i32 = arith.constant 0 : i32
    %c0_i32_0 = arith.constant 0 : i32
    %c0_i32_1 = arith.constant 0 : i32
    return %arg0, %arg1, %c0_i32, %c0_i32_0 : i32, i32, i32, i32
  }
}

</mosaic_0001>

<bundles_post_ra>
// kernel: tpu_custom_call.1
= control target key start
LH: loop header
LB: loop body
LE: loop exit
PB: predicated region body
PF: predicated region fallthrough
CT: control target
= control target key end

     0   :  { %7 = vsyncpa [#allocation3], 0  ;;  %s244_s0 = inlined_call_operand.hbm [shape: f32[2,3,8,128], index: 0, kind: input, shape index: {}]   ;;  %s245_s1 = inlined_call_operand.hbm [shape: f32[2,3,8,128], index: 1, kind: input, shape index: {}]   ;;  %s246_s2 = inlined_call_operand.hbm [shape: f32[1,1,8,128], index: 2, kind: output, shape index: {}]  }
   0x1   :  { %8 = vsyncpa [#allocation6], 0 }
   0x2   :  { %9 = vsyncpa [#allocation4], 0  ;;  %s215_s9 = smov [#allocation2]  }
   0x3   :  { %s15_s10 = sshll.u32 %s215_s9, 4  ;;  %s16_s10 = int_to_ptr.vmem [resolvable:$true] %s15_s10 }
   0x4   :  { %s157_s11 = scalar_lea.vmem %s16_s10, 768  ;;  %p162_p1 = scmp.lt.s32.totalorder %s16_s10, %s16_s10 }
   0x5   :  { %p158_p0 = scmp.ne.s32.totalorder %s16_s10, %s157_s11  ;;  %p163_p2 = scmp.lt.s32.totalorder %s157_s11, %s157_s11 }
   0x7   :  { %p164_p3 = por %p163_p2, %p162_p1 }
   0x9   :  { %p165_p4 = pnand %p164_p3, %p158_p0 }
   0xb   :  { %168 = shalt.err (!%p165_p4)
}
   0xc   :  { %s216_s12 = smov 128   ;;  %s217_s13 = smov 8  }
   0xd   :  { %21 = dma.hbm_to_vmem [thread:$0]  %s244_s0, 768, %s16_s10, [#allocation3], %s216_s12, %s216_s12, %s217_s13  }
   0xe   :  { %s218_s16 = smov [#allocation5]  }
   0xf   :  { %s27_s17 = sshll.u32 %s218_s16, 4  ;;  %s28_s17 = int_to_ptr.vmem [resolvable:$true] %s27_s17 }
  0x10   :  { %s177_s18 = scalar_lea.vmem %s28_s17, 768  ;;  %p182_p6 = scmp.lt.s32.totalorder %s28_s17, %s28_s17 }
  0x11   :  { %p178_p5 = scmp.ne.s32.totalorder %s28_s17, %s177_s18  ;;  %p183_p7 = scmp.lt.s32.totalorder %s177_s18, %s177_s18 }
  0x13   :  { %p184_p8 = por %p183_p7, %p182_p6 }
  0x15   :  { %p185_p9 = pnand %p184_p8, %p178_p5 }
  0x17   :  { %188 = shalt.err (!%p185_p9)
}
  0x18   :  { %33 = dma.hbm_to_vmem [thread:$0]  %s245_s1, 768, %s28_s17, [#allocation6], %s216_s12, %s216_s12, %s217_s13  }
  0x19   :  { %209 = dma.done.wait [#allocation3], 768  }
  0x1a   :  { %210 = vsyncadd [#allocation3], 4294966528 }
  0x1b   :  { %211 = dma.done.wait [#allocation6], 768  }
  0x1c   :  { %212 = vsyncadd [#allocation6], 4294966528  ;;  %v40_v0 = vld [vmem:[#allocation2] sm:$0xff]  ;;  %v41_v1 = vld [vmem:[#allocation2 + $0x8] sm:$0xff]  ;;  %v108_v54 = vlaneseq  ;;  %s219_s0 = smov [#allocation7]  }
  0x1d   :  { %v42_v2 = vld [vmem:[#allocation2 + $0x10] sm:$0xff]  ;;  %v43_v3 = vld [vmem:[#allocation2 + $0x18] sm:$0xff]  ;;  %v44_v4 = vld [vmem:[#allocation2 + $0x20] sm:$0xff]  ;;  %s130_s1 = sshll.u32 %s219_s0, 4  ;;  %s131_s1 = int_to_ptr.vmem [resolvable:$true] %s130_s1 }
  0x1e   :  { %v45_v5 = vld [vmem:[#allocation2 + $0x28] sm:$0xff]  ;;  %v46_v6 = vld [vmem:[#allocation5] sm:$0xff]  ;;  %v47_v7 = vld [vmem:[#allocation5 + $0x8] sm:$0xff]  ;;  %v109_v55 = vshrl.u32 %v108_v54, 7  ;;  %v111_v56 = vand.u32 127, %v108_v54  ;;  %s189_s21 = scalar_lea.vmem %s131_s1, 128  ;;  %p194_p11 = scmp.lt.s32.totalorder %s131_s1, %s131_s1 }
  0x1f   :  { %v48_v8 = vld [vmem:[#allocation5 + $0x10] sm:$0xff]  ;;  %v49_v9 = vld [vmem:[#allocation5 + $0x18] sm:$0xff]  ;;  %v50_v10 = vld [vmem:[#allocation5 + $0x20] sm:$0xff]  ;;  %v52_v12 = vsub.f32 %v40_v0, %v46_v6  ;;  %v56_v13 = vsub.f32 %v41_v1, %v47_v7  ;;  %v64_v15 = vadd.f32 %v46_v6, %v40_v0  ;;  %p190_p10 = scmp.ne.s32.totalorder %s131_s1, %s189_s21  ;;  %p195_p12 = scmp.lt.s32.totalorder %s189_s21, %s189_s21 }
  0x20   :  { %v51_v11 = vld [vmem:[#allocation5 + $0x28] sm:$0xff]  ;;  %v60_v14 = vsub.f32 %v42_v2, %v48_v8  ;;  %v53_v16 = vsub.f32 %v43_v3, %v49_v9  ;;  %v57_v17 = vsub.f32 %v44_v4, %v50_v10  ;;  %v65_v19 = vadd.f32 %v49_v9, %v43_v3 }
  0x21   :  { %v61_v18 = vsub.f32 %v45_v5, %v51_v11  ;;  %v54_v20 = vmul.f32 127.5, %v52_v12  ;;  %v58_v21 = vmul.f32 127.5, %v56_v13  ;;  %v66_v23 = vmul.f32 63.75, %v64_v15  ;;  %p196_p13 = por %p195_p12, %p194_p11 }
  0x22   :  { %v62_v22 = vmul.f32 127.5, %v60_v14  ;;  %v55_v24 = vmul.f32 127.5, %v53_v16  ;;  %v59_v25 = vmul.f32 127.5, %v57_v17  ;;  %v67_v27 = vmul.f32 63.75, %v65_v19 }
  0x23   :  { %v63_v26 = vmul.f32 127.5, %v61_v18  ;;  %v68_v28 = vadd.f32 127.5, %v66_v23  ;;  %v78_v29 = vmul.f32 %v58_v21, %v58_v21  ;;  %v74_v33 = vmul.f32 %v54_v20, %v54_v20  ;;  %p197_p0 = pnand %p196_p13, %p190_p10 }
  0x24   :  { %v69_v30 = vadd.f32 127.5, %v67_v27  ;;  %v79_v31 = vmul.f32 %v59_v25, %v59_v25  ;;  %v86_v34 = vmul.f32 %v62_v22, %v62_v22  ;;  %v75_v36 = vmul.f32 %v55_v24, %v55_v24 }
  0x25   :  { %v70_v32 = vmul.f32 0.00390625, %v68_v28  ;;  %v87_v37 = vmul.f32 %v63_v26, %v63_v26  ;;  %v80_v39 = vmul.f32 4.0, %v78_v29  ;;  %v115_v57 = vmul.u32 128, %v109_v55 }
  0x26   :  { %v71_v35 = vmul.f32 0.00390625, %v69_v30  ;;  %v81_v42 = vmul.f32 4.0, %v79_v31 }
  0x27   :  { %v72_v38 = vadd.f32 2.0, %v70_v32  ;;  %v84_v40 = vsub.f32 2.9960938, %v70_v32  ;;  %v116_v58 = vadd.s32 %v115_v57, %v111_v56 }
  0x28   :  { %v73_v41 = vadd.f32 2.0, %v71_v35  ;;  %v85_v43 = vsub.f32 2.9960938, %v71_v35 }
  0x29   :  { %v76_v44 = vmul.f32 %v74_v33, %v72_v38  ;;  %v88_v45 = vmul.f32 %v86_v34, %v84_v40  ;;  %vm117_vm4 = vcmp.lt.s32.totalorder %v116_v58, 256 }
  0x2a   :  { %v77_v46 = vmul.f32 %v75_v36, %v73_v41  ;;  %v89_v47 = vmul.f32 %v87_v37, %v85_v43 }
  0x2b   :  { %v82_v48 = vadd.f32 %v80_v39, %v76_v44 }
  0x2c   :  { %v83_v49 = vadd.f32 %v81_v42, %v77_v46 }
  0x2d   :  { %v90_v50 = vadd.f32 %v88_v45, %v82_v48 }
  0x2e   :  { %v91_v51 = vadd.f32 %v89_v47, %v83_v49 }
  0x2f   :  { %v92_v52 = vadd.f32 1e-08, %v90_v50 }
  0x30   :  { %v93_v53 = vadd.f32 1e-08, %v91_v51 }
  0x31   :  { %145 = vrsqrt.f32 %v92_v52  ;;  %vm96_vm0 = vcmp.eq.f32.partialorder %v92_v52, inf  ;;  %v99_v60 = vand.u32 2147483648, %v92_v52  ;;  %vm98_vm1 = vcmp.eq.f32.partialorder %v92_v52, 0.0 }
  0x32   :  { %147 = vrsqrt.f32 %v93_v53  ;;  %vm103_vm2 = vcmp.eq.f32.partialorder %v93_v53, inf  ;;  %v106_v63 = vand.u32 2147483648, %v93_v53  ;;  %vm105_vm3 = vcmp.eq.f32.partialorder %v93_v53, 0.0 }
  0x3e   :  { %v146_v59 = vpop.eup %145 }
  0x3f   :  { %v148_v61 = vpop.eup %147  ;;  %v95_v62 = vmul.f32 %v146_v59, %v92_v52 }
  0x40   :  { %v102_v0 = vmul.f32 %v148_v61, %v93_v53 }
  0x41   :  { %v97_v1 = vsel %vm96_vm0, %v92_v52, %v95_v62 }
  0x42   :  { %v100_v2 = vsel %vm98_vm1, %v99_v60, %v97_v1  ;;  %v104_v3 = vsel %vm103_vm2, %v93_v53, %v102_v0 }
  0x43   :  { %v107_v4 = vsel %vm105_vm3, %v106_v63, %v104_v3  ;;  %v120_v5 = vsel %vm117_vm4, %v100_v2, 0.0 }
  0x44   :  { %v121_v6 = vsel %vm117_vm4, %v107_v4, 0.0 }
  0x45   :  { %v122_v7 = vadd.f32 %v121_v6, %v120_v5 }
  0x47   :  { %123 = vst [vmem:[#allocation7] sm:$0xff] %v122_v7 }
  0x48   :  { %200 = shalt.err (!%p197_p0)
}
  0x49   :  { %133 = dma.vmem_to_hbm [thread:$0]  %s131_s1, 128, %s246_s2, [#allocation4]  }
  0x4a   :  { %213 = dma.done.wait [#allocation4], 128  }
  0x4b   :  { %214 = vsyncadd [#allocation4], 4294967168 }
  0x4c   :  { %137 = vsyncpa [#allocation3], 1 }
  0x4d   :  { %138 = vsyncpa [#allocation6], 1 }
  0x4e   :  { %139 = vsyncpa [#allocation4], 1 }

</bundles_post_ra>
